<compile_context>
chip_gen: v7x
topology: tpu7x:2x2x1
jax: 0.10.0
libtpu: 0.0.40
codegen_flags: <defaults>
</compile_context>

<pallas_src>
import jax
import jax.numpy as jnp
from jax.experimental import pallas as pl
from jax.experimental.pallas import tpu as pltpu

_LANE = 128


def _round_up(n: int, m: int) -> int:
    return ((n + m - 1) // m) * m


def _sublane(dtype) -> int:
    itemsize = jnp.dtype(dtype).itemsize
    return {4: 8, 2: 16, 1: 32}.get(itemsize, 8)


def _vmem_budget():
    """VMEM-capacity-aware block target and scoped-VMEM limit."""
    cap = 64 << 20  # conservative default = v7x per-TC VMEM
    try:
        info = pltpu.get_tpu_info()
        cap = int(getattr(info, "vmem_capacity_bytes", cap))
    except Exception:
        pass
    # ~8 MiB blocks on v5e/v6e (128 MiB VMEM), ~4 MiB on v7x (64 MiB per TC).
    block_target = max(1 << 20, min(cap // 16, 8 << 20))
    # Headroom for 2x double-buffered in/out blocks + Mosaic f32 intermediates.
    vmem_limit = max(32 << 20, min((cap * 3) // 4, 96 << 20))
    return block_target, vmem_limit


# --------------------------------------------------------------------------
# Kernels
# --------------------------------------------------------------------------
def _softmax_last_kernel(x_ref, o_ref):
    """Numerically-stable softmax along the last (lane) axis of a 2-D block."""
    x = x_ref[...].astype(jnp.float32)
    m = jnp.max(x, axis=-1, keepdims=True)
    e = jnp.exp(x - m)
    s = jnp.sum(e, axis=-1, keepdims=True)
    # Exact division (not pl.reciprocal(approx=True)): DMA-bound kernel, the
    # precise divide is free and matches nn.Softmax / jax.nn.softmax.
    o_ref[...] = (e / s).astype(o_ref.dtype)


def _softmax_axis1_kernel(x_ref, o_ref):
    """Softmax over axis 1 (channels, on sublanes) of a (1, C, tm) block."""
    x = x_ref[...].astype(jnp.float32)
    m = jnp.max(x, axis=1, keepdims=True)
    e = jnp.exp(x - m)
    s = jnp.sum(e, axis=1, keepdims=True)
    o_ref[...] = (e / s).astype(o_ref.dtype)


# --------------------------------------------------------------------------
# Wrappers
# --------------------------------------------------------------------------
def _softmax_2d_last(x2d: jax.Array) -> jax.Array:
    """Softmax over the last axis of a [rows, features] array."""
    R, F = x2d.shape
    dt = x2d.dtype
    itemsize = jnp.dtype(dt).itemsize
    sub = _sublane(dt)
    block_target, vmem_limit = _vmem_budget()

    # Rows per block; the feature axis is kept at full width (block dim equal
    # to the array dim is always legal), so no padding / slicing is needed.
    row_bytes = F * 4  # f32 compute copy dominates the VMEM footprint
    if R * row_bytes <= block_target:
        tb = R
    else:
        tb = max(sub, (block_target // row_bytes) // sub * sub)
        # Keep >= ~4 grid steps (feeds both v7x TensorCores / the pipeline);
        # only kicks in when blocks still stay >= block_target / 4.
        cap4 = max(sub, _round_up(pl.cdiv(R, 4), sub))
        tb = min(tb, cap4)
    tb = min(tb, R)  # tb == R (full dim) or a sublane multiple: both legal

    grid = (pl.cdiv(R, tb),)
    return pl.pallas_call(
        _softmax_last_kernel,
        out_shape=jax.ShapeDtypeStruct((R, F), dt),
        grid=grid,
        in_specs=[pl.BlockSpec((tb, F), lambda i: (i, 0))],
        out_specs=pl.BlockSpec((tb, F), lambda i: (i, 0)),
        compiler_params=pltpu.CompilerParams(
            dimension_semantics=("parallel",),
            vmem_limit_bytes=vmem_limit,
        ),
        cost_estimate=pl.CostEstimate(
            flops=4 * R * F,
            transcendentals=R * F,
            bytes_accessed=2 * R * F * itemsize,
        ),
    )(x2d)


def _softmax_channels_3d(x3: jax.Array) -> jax.Array:
    """Softmax over axis 1 of a (N, C, M) array (M = flattened spatial)."""
    N, C, M = x3.shape
    dt = x3.dtype
    itemsize = jnp.dtype(dt).itemsize
    block_target, vmem_limit = _vmem_budget()

    col_bytes = C * 4  # f32 bytes per spatial position
    if M <= _LANE or M * col_bytes <= block_target:
        tm = M  # full trailing extent in one block (always legal)
    else:
        tm = max(_LANE, (block_target // col_bytes) // _LANE * _LANE)
        tm = min(tm, _round_up(M, _LANE))

    grid = (N, pl.cdiv(M, tm))
    return pl.pallas_call(
        _softmax_axis1_kernel,
        out_shape=jax.ShapeDtypeStruct((N, C, M), dt),
        grid=grid,
        in_specs=[pl.BlockSpec((1, C, tm), lambda n, j: (n, 0, j))],
        out_specs=pl.BlockSpec((1, C, tm), lambda n, j: (n, 0, j)),
        compiler_params=pltpu.CompilerParams(
            dimension_semantics=("parallel", "parallel"),
            vmem_limit_bytes=vmem_limit,
        ),
        cost_estimate=pl.CostEstimate(
            flops=4 * N * C * M,
            transcendentals=N * C * M,
            bytes_accessed=2 * N * C * M * itemsize,
        ),
    )(x3)


def softmax_dim1(x: jax.Array) -> jax.Array:
    """Equivalent of torch.nn.Softmax(dim=1)(x) for inputs with ndim >= 2."""
    if x.ndim < 2:
        raise ValueError("nn.Softmax(dim=1) requires ndim >= 2")
    if x.ndim == 2:
        # dim=1 is the last axis -> lane-axis softmax.
        return _softmax_2d_last(x)
    # ndim > 2 (e.g. NCHW): flatten trailing dims -> (N, C, M), a free
    # contiguous reshape (no moveaxis/transpose HBM passes), and normalize
    # over the channel (sublane) axis inside the kernel.
    N, C = x.shape[0], x.shape[1]
    M = 1
    for d in x.shape[2:]:
        M *= d
    y = _softmax_channels_3d(x.reshape(N, C, M))
    return y.reshape(x.shape)


if __name__ == "__main__":
    key = jax.random.PRNGKey(0)
    k1, k2, k3 = jax.random.split(key, 3)

    # NCHW input: nn.Softmax(dim=1) normalizes over channels.
    x_nchw = jax.random.normal(k1, (2, 4, 16, 16), dtype=jnp.float32)
    # 2-D, feature dim not a multiple of 128 (full-width block, no padding).
    x_small = jax.random.normal(k2, (4, 32), dtype=jnp.float32)
    # 2-D, lane-aligned feature dim.
    x_aligned = jax.random.normal(k3, (8, 128), dtype=jnp.float32)

    for x in (x_nchw, x_small, x_aligned):
        out = jax.block_until_ready(softmax_dim1(x))
        ref = jax.nn.softmax(x, axis=1)
        assert out.shape == x.shape
        assert jnp.allclose(out, ref, atol=1e-5, rtol=1e-5), \
            "mismatch vs jax.nn.softmax"
        sums = jnp.sum(out, axis=1)
        assert jnp.allclose(sums, jnp.ones_like(sums), atol=1e-5), \
            "softmax outputs do not sum to 1 along dim=1"

    print("KERNEL_OK")
</pallas_src>

<mosaic_0001>
module attributes {stable_mosaic.version = 11 : i64} {
  func.func @_softmax_axis1_kernel(%arg0: i32, %arg1: i32, %arg2: memref<1x4x256xf32, #tpu.memory_space<vmem>>, %arg3: memref<1x4x256xf32, #tpu.memory_space<vmem>>) attributes {dimension_semantics = [#tpu.dimension_semantics<parallel>, #tpu.dimension_semantics<parallel>], iteration_bounds = array<i64: 2, 1>, scalar_prefetch = 0 : i64, scratch_operands = 0 : i64, tpu.core_type = #tpu.core_type<tc>, window_params = [{transform_indices = @transform_0, window_bounds = array<i64: 1, 4, 256>}, {transform_indices = @transform_1, window_bounds = array<i64: 1, 4, 256>}]} {
    %c0 = arith.constant 0 : index
    %c0_0 = arith.constant 0 : index
    %c0_1 = arith.constant 0 : index
    %0 = vector.load %arg2[%c0, %c0_0, %c0_1] : memref<1x4x256xf32, #tpu.memory_space<vmem>>, vector<1x4x256xf32>
    %cst = arith.constant dense<0xFF800000> : vector<1x256xf32>
    %1 = vector.multi_reduction <maximumf>, %0, %cst [1] : vector<1x4x256xf32> to vector<1x256xf32>
    %2 = vector.shape_cast %1 : vector<1x256xf32> to vector<1x1x256xf32>
    %3 = vector.broadcast %2 : vector<1x1x256xf32> to vector<1x4x256xf32>
    %4 = arith.subf %0, %3 : vector<1x4x256xf32>
    %5 = math.exp %4 : vector<1x4x256xf32>
    %cst_2 = arith.constant dense<0.000000e+00> : vector<1x256xf32>
    %6 = vector.multi_reduction <add>, %5, %cst_2 [1] : vector<1x4x256xf32> to vector<1x256xf32>
    %7 = vector.shape_cast %6 : vector<1x256xf32> to vector<1x1x256xf32>
    %8 = vector.broadcast %7 : vector<1x1x256xf32> to vector<1x4x256xf32>
    %9 = arith.divf %5, %8 : vector<1x4x256xf32>
    %c0_3 = arith.constant 0 : index
    %c0_4 = arith.constant 0 : index
    %c0_5 = arith.constant 0 : index
    %10 = vector.load %arg3[%c0_3, %c0_4, %c0_5] : memref<1x4x256xf32, #tpu.memory_space<vmem>>, vector<1x4x256xf32>
    tpu.vector_store %arg3[%c0_3, %c0_4, %c0_5], %9 {strides = array<i32>} : memref<1x4x256xf32, #tpu.memory_space<vmem>>, vector<1x4x256xf32>,
    return
  }
  func.func @transform_0(%arg0: i32, %arg1: i32) -> (i32, i32, i32) {
    %c0_i32 = arith.constant 0 : i32
    %c0_i32_0 = arith.constant 0 : i32
    return %arg0, %c0_i32, %arg1 : i32, i32, i32
  }
  func.func @transform_1(%arg0: i32, %arg1: i32) -> (i32, i32, i32) {
    %c0_i32 = arith.constant 0 : i32
    %c0_i32_0 = arith.constant 0 : i32
    return %arg0, %c0_i32, %arg1 : i32, i32, i32
  }
}

</mosaic_0001>

<bundles_post_ra>
// kernel: tpu_custom_call.1
= control target key start
LH: loop header
LB: loop body
LE: loop exit
PB: predicated region body
PF: predicated region fallthrough
CT: control target
= control target key end

     0   :  { %6 = vsyncpa [#allocation3], 0  ;;  %s694_s0 = inlined_call_operand.hbm [shape: f32[2,4,256], index: 0, kind: input, shape index: {}]   ;;  %s695_s1 = inlined_call_operand.hbm [shape: f32[2,4,256], index: 1, kind: output, shape index: {}]  }
   0x1   :  { %8 = vsyncpa [#allocation3 + $0x1], 0 }
   0x2   :  { %9 = vsyncpa [#allocation4], 0 }
   0x3   :  { %11 = vsyncpa [#allocation4 + $0x1], 0  ;;  %s514_s6 = smov 0   ;;  %s516_s7 = smov 0  }
   0x4   :  { %s518_s8 = smov 0   ;;  %s520_s9 = smov 0  }
   0x5   :  { %s522_s10 = smov 0   ;;  %s524_s11 = smov 0  }
   0x6 LB: > { %s304_s12 = sadd.s32 4294967295, %s500_s11   ;;  %s305_s13 = sadd.s32 4294967294, %s500_s11   ;;  %s500_s11 = sphi %s524_s11, %s17_s11   ;;  %s496_s10 = sphi %s522_s10, %s711_s10   ;;  %s492_s9 = sphi %s520_s9, %s710_s9   ;;  %s488_s8 = sphi %s518_s8, %s709_s8   ;;  %s484_s7 = sphi %s516_s7, %s708_s7   ;;  %s480_s6 = sphi %s514_s6, %s707_s6  }
   0x7   : > { %s29_s14 = sadd.s32 1, %s496_s10  ;;  %s38_s15 = sadd.s32 1, %s488_s8 }
   0x8   : > { %p31_p0 = scmp.ge.s32.totalorder %s29_s14, 2  ;;  %p45_p1 = scmp.ne.s32.totalorder %s488_s8, %s484_s7 }
   0x9   : > { %p46_p2 = scmp.eq.s32.totalorder %s500_s11, 0  ;;  %p51_p3 = scmp.ne.s32.totalorder %s484_s7, %s480_s6 }
   0xa   : > { %s713_s14 = smov (%p31_p0, %s29_s14), 0  ;;  %p52_p5 = scmp.eq.s32.totalorder %s304_s12, 0 }
   0xb   : > { %p555_p4 = por %p46_p2, %p45_p1  ;;  %s33_s17 = ssub.s32 %s496_s10, %s713_s14 }
   0xc   : > { %p77_p6 = scmp.eq.s32.totalorder %s304_s12, 1  ;;  %p36_p7 = scmp.eq.s32.totalorder %s33_s17, 0 }
   0xd   : > { %p561_p8 = por %p52_p5, %p51_p3  ;;  %p83_p10 = scmp.eq.s32.totalorder %s305_s13, 1 }
   0xe   : > { %p565_p9 = por %p77_p6, %p45_p1  ;;  %p333_p13 = scmp.lt.s32.totalorder %s500_s11, 2 }
   0xf   : > { %s570_s20 = scalar_select %p36_p7, %s488_s8, %s38_s15  }
  0x10   : > { %s699_s19 = scalar_select %p565_p9, 1, 0 }
  0x11   : > { %p572_p11 = por %p83_p10, %p51_p3  ;;  %s103_s22 = sand.u32 1, %s488_s8  }
  0x12   : > { %s308_s23 = sshll.u32 %s103_s22, 3  ;;  %s319_s24 = sshll.u32 %s496_s10, 7 }
  0x13   : > { %s700_s21 = scalar_select %p572_p11, 1, 0 }
  0x14   : > { %s583_s27 = scalar_lea.hbm %s694_s0, %s319_s24  ;;  %s107_s28 = scalar_lea.vmem [#allocation2], %s308_s23 }
  0x15   : > { %s117_s29 = sshll.u32 %s107_s28, 4  ;;  %p589_p0 = pnand %p333_p13, %p555_p4  ;;  %s585_s29 = int_to_ptr.vmem [resolvable:$true] %s117_s29 }
  0x16   : > { %s104_s2 = scalar_lea.sflag [#allocation3], %s103_s22  ;;  %s388_s3 = scalar_lea.hbm %s583_s27, 128 }
  0x17   : > { %p389_p3 = scmp.ne.s32.totalorder %s583_s27, %s388_s3  ;;  %p390_p5 = pneg %p589_p0 }
  0x18   : > { %s393_s12 = scalar_lea.hbm %s694_s0, 256  ;;  %p394_p4 = scmp.lt.u32.totalorder %s583_s27, %s694_s0 }
  0x19   : > { %p391_p6 = pnand %p390_p5, %p389_p3  ;;  %p395_p10 = scmp.lt.u32.totalorder %s393_s12, %s388_s3 }
  0x1a   : > { %p397_p12 = scmp.lt.u32.totalorder %s388_s3, %s583_s27 }
  0x1b   : > { %p392_p7 = pneg %p391_p6  ;;  %p396_p13 = por %p395_p10, %p394_p4 }
  0x1d   : > { %p398_p1 = por %p397_p12, %p396_p13 }
  0x1f   : > { %p399_p2 = pnand %p398_p1, %p392_p7 }
  0x21   : > { %402 = shalt.err (!%p399_p2)
}
  0x22   : > { %s403_s16 = scalar_lea.vmem %s585_s29, 128  ;;  %s502_s17 = smov [#allocation2]  }
  0x23   : > { %p404_p3 = scmp.ne.s32.totalorder %s585_s29, %s403_s16  ;;  %s408_s22 = sshll.u32 %s502_s17, 4  ;;  %s409_s22 = int_to_ptr.vmem [resolvable:$false] %s408_s22 }
  0x24   : > { %s410_s23 = scalar_lea.vmem %s409_s22, 256  ;;  %p411_p9 = scmp.lt.s32.totalorder %s585_s29, %s409_s22 }
  0x25   : > { %p406_p6 = pnand %p404_p3, %p390_p5  ;;  %p412_p4 = scmp.lt.s32.totalorder %s410_s23, %s403_s16 }
  0x27   : > { %p407_p11 = pneg %p406_p6  ;;  %p413_p10 = por %p412_p4, %p411_p9 }
  0x29   : > { %p414_p12 = pnand %p413_p10, %p407_p11 }
  0x2b   : > { %417 = shalt.err (!%p414_p12)
}
  0x2c   : > { %328 = dma.hbm_to_vmem [thread:$0]  (!%p589_p0), %s583_s27, 128, %s585_s29, %s104_s2  }
  0x2d   : > { %p702_p1 = scmp.lt.s32.totalorder %s500_s11, 3  ;;  %p703_p2 = scmp.ge.s32.totalorder %s500_s11, 1 }
  0x2f   : > { %p123_p5 = pnand %p703_p2, %p702_p1 }
  0x30   : > { %s625_s24 = sand.u32 (!%p123_p5), 1, %s484_s7  }
  0x31   : > { %126 = sbr.rel (%p123_p5) target bundleno = 134 (0x86), region = 24  ;;  %s312_s25 = sshll.u32 (!%p123_p5), %s625_s24, 3 }
  0x32   : > { %s129_s26 = scalar_lea.sflag (!%p123_p5), [#allocation3], %s625_s24  ;;  %s132_s28 = scalar_lea.vmem (!%p123_p5), [#allocation2], %s312_s25 }
  0x38   : > { %471 = dma.done.wait (%p561_p8), %s129_s26, 128  }
  0x39   : > { %473 = vsyncadd (%p561_p8), %s129_s26, 4294967168  ;;  %vm157_vm0 = vcmask 1043456   ;;  %v153_v0 = vld [vmem:[%s132_s28] sm:$0xff]  ;;  %s150_s18 = scalar_lea.vmem [#allocation5], %s312_s25  ;;  %s320_s29 = sshll.u32 %s492_s9, 7 }
  0x3a   : > { %v155_v1 = vcombine.high %v153_v0, %v153_v0  ;;  %v158_v2 = vsel %vm157_vm0, %v153_v0, -inf  ;;  %s220_s27 = sshll.u32 %s150_s18, 4  ;;  %s647_s3 = scalar_lea.hbm %s695_s1, %s320_s29  ;;  %s642_s27 = int_to_ptr.vmem [resolvable:$true] %s220_s27 }
  0x3b   : > { %v159_v3 = vrot.slane %v158_v2, 4  ;;  %s204_s4 = scalar_lea.sflag [#allocation4], %s625_s24  ;;  %s418_s5 = scalar_lea.vmem %s642_s27, 128 }
  0x3c   : > { %v165_v4 = vsel %vm157_vm0, %v155_v1, -inf  ;;  %p419_p8 = scmp.ne.s32.totalorder %s642_s27, %s418_s5  ;;  %p704_p9 = scmp.ne.s32.totalorder %s699_s19, 0 }
  0x3d   : > { %v160_v5 = vmax.f32 %v158_v2, %v159_v3  ;;  %v166_v6 = vrot.slane %v165_v4, 4  ;;  %s503_s9 = smov [#allocation5]  }
  0x3e   : > { %p420_p11 = pnand %p419_p8, %p704_p9  ;;  %s422_s12 = sshll.u32 %s503_s9, 4  ;;  %s423_s12 = int_to_ptr.vmem [resolvable:$false] %s422_s12 }
  0x3f   : > { %v161_v7 = vrot.slane %v160_v5, 2  ;;  %v167_v8 = vmax.f32 %v165_v4, %v166_v6  ;;  %s424_s13 = scalar_lea.vmem %s423_s12, 256  ;;  %p425_p7 = scmp.lt.s32.totalorder %s642_s27, %s423_s12 }
  0x40   : > { %p421_p0 = pneg %p420_p11  ;;  %p426_p13 = scmp.lt.s32.totalorder %s424_s13, %s418_s5 }
  0x41   : > { %v162_v9 = vmax.f32 %v160_v5, %v161_v7  ;;  %v168_v10 = vrot.slane %v167_v8, 2 }
  0x42   : > { %p427_p3 = por %p426_p13, %p425_p7 }
  0x43   : > { %v163_v11 = vrot.slane %v162_v9, 1  ;;  %v169_v12 = vmax.f32 %v167_v8, %v168_v10 }
  0x44   : > { %p428_p6 = pnand %p427_p3, %p421_p0 }
  0x45   : > { %v164_v13 = vmax.f32 %v162_v9, %v163_v11  ;;  %v170_v14 = vrot.slane %v169_v12, 1 }
  0x47   : > { %v171_v15 = vmax.f32 %v169_v12, %v170_v14 }
  0x49   : > { %v174_v16 = vcombine.low %v164_v13, %v171_v15 }
  0x4b   : > { %v176_v17 = vsub.f32 %v153_v0, %v174_v16 }
  0x4d   : > { %v177_v18 = vmul.f32 1.442695, %v176_v17 }
  0x4f   : > { %384 = vpow2.f32 %v177_v18 }
  0x59   : > { %v385_v19 = vpop.eup %384 }
  0x5a   : > { %v180_v20 = vcombine.high %v385_v19, %v385_v19  ;;  %v182_v21 = vsel %vm157_vm0, %v385_v19, 0.0 }
  0x5b   : > { %v183_v22 = vrot.slane %v182_v21, 4 }
  0x5c   : > { %v189_v23 = vsel %vm157_vm0, %v180_v20, 0.0 }
  0x5d   : > { %v184_v24 = vadd.f32 %v183_v22, %v182_v21  ;;  %v190_v25 = vrot.slane %v189_v23, 4 }
  0x5f   : > { %v185_v26 = vrot.slane %v184_v24, 2  ;;  %v191_v27 = vadd.f32 %v190_v25, %v189_v23 }
  0x61   : > { %v186_v28 = vadd.f32 %v185_v26, %v184_v24  ;;  %v192_v29 = vrot.slane %v191_v27, 2 }
  0x63   : > { %v187_v30 = vrot.slane %v186_v28, 1  ;;  %v193_v31 = vadd.f32 %v192_v29, %v191_v27 }
  0x65   : > { %v188_v32 = vadd.f32 %v187_v30, %v186_v28  ;;  %v194_v33 = vrot.slane %v193_v31, 1 }
  0x67   : > { %v195_v34 = vadd.f32 %v194_v33, %v193_v31 }
  0x69   : > { %v198_v35 = vcombine.low %v188_v32, %v195_v34 }
  0x6b   : > { %386 = vrcp.f32 %v198_v35 }
  0x75   : > { %v387_v36 = vpop.eup %386 }
  0x76   : > { %v201_v37 = vmul.f32 %v387_v36, %v385_v19 }
  0x78   : > { %202 = vst [vmem:[%s150_s18] sm:$0xff] %v201_v37 }
  0x79   : > { %431 = shalt.err (!%p428_p6)
}
  0x7a   : > { %s432_s15 = scalar_lea.hbm %s647_s3, 128  ;;  %s436_s22 = scalar_lea.hbm %s695_s1, 256 }
  0x7b   : > { %p433_p4 = scmp.ne.s32.totalorder %s647_s3, %s432_s15  ;;  %p437_p1 = scmp.lt.u32.totalorder %s647_s3, %s695_s1 }
  0x7c   : > { %p438_p2 = scmp.lt.u32.totalorder %s436_s22, %s432_s15  ;;  %p440_p8 = scmp.lt.u32.totalorder %s432_s15, %s647_s3 }
  0x7d   : > { %p434_p10 = pnand %p433_p4, %p704_p9 }
  0x7e   : > { %p439_p5 = por %p438_p2, %p437_p1 }
  0x7f   : > { %p435_p12 = pneg %p434_p10 }
  0x80   : > { %p441_p11 = por %p440_p8, %p439_p5 }
  0x82   : > { %p442_p0 = pnand %p441_p11, %p435_p12 }
  0x84   : > { %445 = shalt.err (!%p442_p0)
}
  0x85   : > { %323 = dma.vmem_to_hbm [thread:$0]  (%p704_p9), %s642_s27, 128, %s647_s3, %s204_s4  }
  0x86 PF: > { %s232_s25 = sand.u32 1, %s480_s6   ;;  %p705_p7 = scmp.ne.s32.totalorder %s700_s21, 0 }
  0x87   : > { %p706_p13 = scmp.ge.s32.totalorder %s500_s11, 2  ;;  %s233_s26 = scalar_lea.sflag [#allocation4], %s232_s25 }
  0x89   : > { %p330_p3 = pnand %p706_p13, %p705_p7 }
  0x8b   : > { %475 = dma.done.wait (!%p330_p3), %s233_s26, 128  }
  0x8c   : > { %477 = vsyncadd (!%p330_p3), %s233_s26, 4294967168  ;;  %s17_s11 = sadd.s32 1, %s500_s11   ;;  %s707_s6 = smov %s484_s7 }
  0x8d   : > { %p14_p6 = scmp.ge.s32.totalorder %s17_s11, 4   ;;  %s708_s7 = smov %s488_s8 }
  0x8e   : > { %s709_s8 = smov %s570_s20  ;;  %s710_s9 = smov %s496_s10 }
  0x8f   : > { %s711_s10 = smov %s713_s14  ;;  %16 = sbr.rel (!%p14_p6) target bundleno = 6 (0x6), region = 69 }
  0x96   :  { %238 = vsyncpa [#allocation3], 1 }
  0x97   :  { %240 = vsyncpa [#allocation3 + $0x1], 1 }
  0x98   :  { %241 = vsyncpa [#allocation4], 1 }
  0x99   :  { %243 = vsyncpa [#allocation4 + $0x1], 1 }

</bundles_post_ra>
